<compile_context>
chip_gen: v7x
topology: tpu7x:2x2x1
jax: 0.10.0
libtpu: 0.0.40
codegen_flags: <defaults>
</compile_context>

<pallas_src>
import functools

import numpy as np
import jax
import jax.numpy as jnp
from jax.experimental import pallas as pl
from jax.experimental.pallas import tpu as pltpu


def _hist_kernel(x_ref, o_ref, *, bins, rows_q, inv_hw, inv_q):
    bt, R, L = x_ref.shape          # (block_batch, 4*rows_q, 128)
    nb = 4 * bins                   # lane-packed bin width (128 for bins=32)
    npp = R * L                     # padded pixels per image

    x = x_ref[...].astype(jnp.float32)
    # torch.histc(min=0, max=1) ignores out-of-range values; padding uses 2.0.
    valid = (x >= 0.0) & (x <= 1.0)
    bidx = jnp.minimum(jnp.floor(x * bins).astype(jnp.int32), bins - 1)

    # Quadrant id from the row index (quadrant-major layout). Comparison-sum
    # instead of integer vector division.
    r_io = jax.lax.broadcasted_iota(jnp.int32, (bt, R, L), 1)
    quad = ((r_io >= rows_q).astype(jnp.int32)
            + (r_io >= 2 * rows_q).astype(jnp.int32)
            + (r_io >= 3 * rows_q).astype(jnp.int32))
    packed = jnp.where(valid, bidx + quad * bins, -1)     # (bt, R, L)

    # Lane-packed one-hot: pixels end up on sublane rows, 4*bins bins on lanes.
    lanes = jax.lax.broadcasted_iota(jnp.int32, (bt, R, L, nb), 3)
    onehot = (packed[..., None] == lanes).astype(jnp.bfloat16)   # exact 0/1
    onehot2 = onehot.reshape(bt * npp, nb)                       # layout-free merge

    # Per-image 0/1 row selector -> one MXU matmul yields every histogram at once.
    img_io = jax.lax.broadcasted_iota(jnp.int32, (bt, bt * npp), 0)
    row_io = jax.lax.broadcasted_iota(jnp.int32, (bt, bt * npp), 1)
    lower = img_io * npp
    selector = ((row_io >= lower) & (row_io < lower + npp)).astype(jnp.bfloat16)

    # Counts are exact integers accumulated in f32 (fine below 2^24 per bin).
    counts = jnp.dot(selector, onehot2, preferred_element_type=jnp.float32)  # (bt, nb)

    q0 = counts[:, 0 * bins:1 * bins]
    q1 = counts[:, 1 * bins:2 * bins]
    q2 = counts[:, 2 * bins:3 * bins]
    q3 = counts[:, 3 * bins:4 * bins]

    # scale-0: whole-image histogram = sum of quadrant counts, / (H*W)
    s0 = jnp.broadcast_to(((q0 + q1 + q2 + q3) * inv_hw)[:, None, None, :],
                          (bt, 4, 4, bins))

    # scale-1: each quadrant histogram (/ (H/2 * W/2)) over its 2x2 spatial block
    def blk(q):
        return jnp.broadcast_to((q * inv_q)[:, None, None, :], (bt, 2, 2, bins))

    s1 = jnp.concatenate(
        [jnp.concatenate([blk(q0), blk(q1)], axis=2),
         jnp.concatenate([blk(q2), blk(q3)], axis=2)], axis=1)   # (bt, 4, 4, bins)

    # module allocates bins*3 channels but only fills num_scales=2 of them
    s2 = jnp.zeros((bt, 4, 4, bins), jnp.float32)

    # single full-tile store per block (no lane-masked partial stores)
    o_ref[...] = jnp.concatenate([s0, s1, s2], axis=-1).astype(o_ref.dtype)


def _choose_block_b(b, npp, bins):
    """Images per grid step: amortize per-step overhead, stay inside VMEM,
    and keep >= 2 grid steps so both v7x TensorCores have work."""
    nb = 4 * bins
    budget = 8 << 20                      # bf16 intermediates budget per step
    bt = 1
    for cand in range(min(b, 16), 0, -1):
        onehot_bytes = cand * npp * nb * 2
        selector_bytes = cand * cand * npp * 2
        if onehot_bytes + selector_bytes <= budget:
            bt = cand
            break
    if b >= 2:
        bt = min(bt, (b + 1) // 2)        # >= 2 parallel grid steps (v7x megacore)
    return max(1, min(bt, b))


def feature_extractor(imgs, *, bins_num=32):
    """JAX/Pallas equivalent of FeatureExtractor.forward (num_scales=2, downscale=2)."""
    b, C, H, W = imgs.shape
    # F.interpolate(x, (H//2*2, W//2*2), mode='area') is the identity for even H, W.
    assert H % 2 == 0 and W % 2 == 0, "even spatial dims assumed (area resize == identity)"

    h2, w2 = H // 2, W // 2
    npix = C * h2 * w2

    # Wrapper-side layout plumbing: quadrant-major, lane-dense (b, 4*rows_q, 128),
    # padded with 2.0 (outside [0, 1] -> ignored by the histogram).
    xq = imgs.reshape(b, C, 2, h2, 2, w2)
    xq = jnp.transpose(xq, (0, 2, 4, 1, 3, 5))          # (b, 2, 2, C, h2, w2), q = 2i + j
    xq = xq.reshape(b, 4, npix)
    rows_q = pl.cdiv(npix, 128)
    pad_pix = rows_q * 128 - npix
    if pad_pix:
        fill = jnp.full((b, 4, pad_pix), 2, dtype=xq.dtype)
        xq = jnp.concatenate([xq, fill], axis=2)
    R = 4 * rows_q
    xq = xq.reshape(b, R, 128)

    npp = R * 128
    bt = _choose_block_b(b, npp, bins_num)
    b_pad = pl.cdiv(b, bt) * bt
    if b_pad != b:
        fill = jnp.full((b_pad - b, R, 128), 2, dtype=xq.dtype)
        xq = jnp.concatenate([xq, fill], axis=0)

    out = pl.pallas_call(
        functools.partial(_hist_kernel, bins=bins_num, rows_q=rows_q,
                          inv_hw=1.0 / float(H * W), inv_q=1.0 / float(h2 * w2)),
        out_shape=jax.ShapeDtypeStruct((b_pad, 4, 4, 3 * bins_num), jnp.float32),
        grid=(b_pad // bt,),
        in_specs=[pl.BlockSpec((bt, R, 128), lambda k: (k, 0, 0))],
        out_specs=pl.BlockSpec((bt, 4, 4, 3 * bins_num), lambda k: (k, 0, 0, 0)),
        compiler_params=pltpu.CompilerParams(dimension_semantics=("parallel",)),
    )(xq)

    # glue: drop batch padding, back to NCHW (b, 3*bins, 4, 4) like the PyTorch module
    return jnp.transpose(out[:b], (0, 3, 1, 2))


def _reference(imgs_np, bins=32):
    """Pure-numpy transcription of the PyTorch forward (for verification)."""
    b, C, H, W = imgs_np.shape
    out = np.zeros((b, bins * 3, 4, 4), np.float32)
    h, w, idx = H, W, 1
    for s in range(2):
        if s != 0:
            h //= 2
            w //= 2
            idx *= 2
        interval = 4 // idx
        for i in range(idx):
            for j in range(idx):
                for k in range(b):
                    region = imgs_np[k, :, i * h:(i + 1) * h, j * w:(j + 1) * w]
                    hist, _ = np.histogram(region, bins=bins, range=(0.0, 1.0))
                    hist = (hist.astype(np.float32) / (h * w))[:, None, None]
                    out[k, bins * s:bins * (s + 1),
                        i * interval:(i + 1) * interval,
                        j * interval:(j + 1) * interval] = hist
    return out


if __name__ == "__main__":
    key = jax.random.PRNGKey(0)
    b, C, H, W = 2, 3, 16, 16
    # image-like values in [0, 1) -- matches histc's min=0, max=1 range
    imgs = jax.random.uniform(key, (b, C, H, W), dtype=jnp.float32)

    out = feature_extractor(imgs, bins_num=32)
    out = jax.block_until_ready(out)

    assert out.shape == (b, 32 * 3, 4, 4)
    ref = _reference(np.asarray(imgs), bins=32)
    np.testing.assert_allclose(np.asarray(out), ref, rtol=1e-5, atol=1e-5)
    print("KERNEL_OK")
</pallas_src>

<mosaic_0001>
module attributes {stable_mosaic.version = 11 : i64} {
  func.func @_hist_kernel(%arg0: i32, %arg1: memref<1x8x128xf32, #tpu.memory_space<vmem>>, %arg2: memref<1x4x4x96xf32, #tpu.memory_space<vmem>>) attributes {dimension_semantics = [#tpu.dimension_semantics<parallel>], iteration_bounds = array<i64: 2>, scalar_prefetch = 0 : i64, scratch_operands = 0 : i64, tpu.core_type = #tpu.core_type<tc>, window_params = [{transform_indices = @transform_0, window_bounds = array<i64: 1, 8, 128>}, {transform_indices = @transform_1, window_bounds = array<i64: 1, 4, 4, 96>}]} {
    %c0 = arith.constant 0 : index
    %c0_0 = arith.constant 0 : index
    %c0_1 = arith.constant 0 : index
    %0 = vector.load %arg1[%c0, %c0_0, %c0_1] : memref<1x8x128xf32, #tpu.memory_space<vmem>>, vector<1x8x128xf32>
    %cst = arith.constant 0.000000e+00 : f32
    %1 = vector.broadcast %cst : f32 to vector<1x8x128xf32>
    %2 = arith.cmpf oge, %0, %1 : vector<1x8x128xf32>
    %cst_2 = arith.constant 1.000000e+00 : f32
    %3 = vector.broadcast %cst_2 : f32 to vector<1x8x128xf32>
    %4 = arith.cmpf ole, %0, %3 : vector<1x8x128xf32>
    %5 = arith.andi %2, %4 : vector<1x8x128xi1>
    %cst_3 = arith.constant 3.200000e+01 : f32
    %6 = vector.broadcast %cst_3 : f32 to vector<1x8x128xf32>
    %7 = arith.mulf %0, %6 : vector<1x8x128xf32>
    %8 = math.floor %7 : vector<1x8x128xf32>
    %9 = arith.fptosi %8 : vector<1x8x128xf32> to vector<1x8x128xi32>
    %c31_i32 = arith.constant 31 : i32
    %10 = vector.broadcast %c31_i32 : i32 to vector<1x8x128xi32>
    %11 = arith.minsi %9, %10 : vector<1x8x128xi32>
    %12 = tpu.iota {dimensions = array<i32: 1>} : vector<1x8x128xi32>
    %c2_i32 = arith.constant 2 : i32
    %13 = vector.broadcast %c2_i32 : i32 to vector<1x8x128xi32>
    %14 = arith.cmpi sge, %12, %13 : vector<1x8x128xi32>
    %15 = arith.extui %14 : vector<1x8x128xi1> to vector<1x8x128xi32>
    %c4_i32 = arith.constant 4 : i32
    %16 = vector.broadcast %c4_i32 : i32 to vector<1x8x128xi32>
    %17 = arith.cmpi sge, %12, %16 : vector<1x8x128xi32>
    %18 = arith.extui %17 : vector<1x8x128xi1> to vector<1x8x128xi32>
    %19 = arith.addi %15, %18 : vector<1x8x128xi32>
    %c6_i32 = arith.constant 6 : i32
    %20 = vector.broadcast %c6_i32 : i32 to vector<1x8x128xi32>
    %21 = arith.cmpi sge, %12, %20 : vector<1x8x128xi32>
    %22 = arith.extui %21 : vector<1x8x128xi1> to vector<1x8x128xi32>
    %23 = arith.addi %19, %22 : vector<1x8x128xi32>
    %c32_i32 = arith.constant 32 : i32
    %24 = vector.broadcast %c32_i32 : i32 to vector<1x8x128xi32>
    %25 = arith.muli %23, %24 : vector<1x8x128xi32>
    %26 = arith.addi %11, %25 : vector<1x8x128xi32>
    %c-1_i32 = arith.constant -1 : i32
    %27 = vector.broadcast %c-1_i32 : i32 to vector<1x8x128xi32>
    %28 = arith.select %5, %26, %27 : vector<1x8x128xi1>, vector<1x8x128xi32>
    %29 = tpu.iota {dimensions = array<i32: 3>} : vector<1x8x128x128xi32>
    %30 = vector.shape_cast %28 : vector<1x8x128xi32> to vector<1x8x128x1xi32>
    %31 = vector.broadcast %30 : vector<1x8x128x1xi32> to vector<1x8x128x128xi32>
    %32 = arith.cmpi eq, %31, %29 : vector<1x8x128x128xi32>
    %33 = arith.extui %32 : vector<1x8x128x128xi1> to vector<1x8x128x128xi32>
    %34 = arith.sitofp %33 : vector<1x8x128x128xi32> to vector<1x8x128x128xf32>
    %35 = arith.truncf %34 : vector<1x8x128x128xf32> to vector<1x8x128x128xbf16>
    %36 = vector.shape_cast %35 : vector<1x8x128x128xbf16> to vector<1024x128xbf16>
    %37 = tpu.iota {dimensions = array<i32: 0>} : vector<1x1024xi32>
    %38 = tpu.iota {dimensions = array<i32: 1>} : vector<1x1024xi32>
    %c1024_i32 = arith.constant 1024 : i32
    %39 = vector.broadcast %c1024_i32 : i32 to vector<1x1024xi32>
    %40 = arith.muli %37, %39 : vector<1x1024xi32>
    %41 = arith.cmpi sge, %38, %40 : vector<1x1024xi32>
    %c1024_i32_4 = arith.constant 1024 : i32
    %42 = vector.broadcast %c1024_i32_4 : i32 to vector<1x1024xi32>
    %43 = arith.addi %40, %42 : vector<1x1024xi32>
    %44 = arith.cmpi slt, %38, %43 : vector<1x1024xi32>
    %45 = arith.andi %41, %44 : vector<1x1024xi1>
    %46 = arith.extui %45 : vector<1x1024xi1> to vector<1x1024xi32>
    %47 = arith.sitofp %46 : vector<1x1024xi32> to vector<1x1024xf32>
    %48 = arith.truncf %47 : vector<1x1024xf32> to vector<1x1024xbf16>
    %cst_5 = arith.constant dense<0.000000e+00> : vector<1x128xf32>
    %49 = tpu.matmul %48, %36, %cst_5 {dimension_numbers = #tpu.dot_dimension_numbers<[1], [0], [0], [1], [0, 0, 1, 1], [], []>} : vector<1x1024xbf16>, vector<1024x128xbf16>, vector<1x128xf32> -> vector<1x128xf32>
    %50 = vector.extract_strided_slice %49 {offsets = [0, 0], sizes = [1, 32], strides = [1, 1]} : vector<1x128xf32> to vector<1x32xf32>
    %51 = vector.extract_strided_slice %49 {offsets = [0, 32], sizes = [1, 32], strides = [1, 1]} : vector<1x128xf32> to vector<1x32xf32>
    %52 = vector.extract_strided_slice %49 {offsets = [0, 64], sizes = [1, 32], strides = [1, 1]} : vector<1x128xf32> to vector<1x32xf32>
    %53 = vector.extract_strided_slice %49 {offsets = [0, 96], sizes = [1, 32], strides = [1, 1]} : vector<1x128xf32> to vector<1x32xf32>
    %54 = arith.addf %50, %51 : vector<1x32xf32>
    %55 = arith.addf %54, %52 : vector<1x32xf32>
    %56 = arith.addf %55, %53 : vector<1x32xf32>
    %cst_6 = arith.constant 3.906250e-03 : f32
    %57 = vector.broadcast %cst_6 : f32 to vector<1x32xf32>
    %58 = arith.mulf %56, %57 : vector<1x32xf32>
    %59 = vector.shape_cast %58 : vector<1x32xf32> to vector<1x1x1x32xf32>
    %60 = vector.shape_cast %59 : vector<1x1x1x32xf32> to vector<1x1x1x32xf32>
    %61 = vector.broadcast %60 : vector<1x1x1x32xf32> to vector<1x4x4x32xf32>
    %cst_7 = arith.constant 1.562500e-02 : f32
    %62 = vector.broadcast %cst_7 : f32 to vector<1x32xf32>
    %63 = arith.mulf %50, %62 : vector<1x32xf32>
    %64 = vector.shape_cast %63 : vector<1x32xf32> to vector<1x1x1x32xf32>
    %65 = vector.shape_cast %64 : vector<1x1x1x32xf32> to vector<1x1x1x32xf32>
    %66 = vector.broadcast %65 : vector<1x1x1x32xf32> to vector<1x2x2x32xf32>
    %cst_8 = arith.constant 1.562500e-02 : f32
    %67 = vector.broadcast %cst_8 : f32 to vector<1x32xf32>
    %68 = arith.mulf %51, %67 : vector<1x32xf32>
    %69 = vector.shape_cast %68 : vector<1x32xf32> to vector<1x1x1x32xf32>
    %70 = vector.shape_cast %69 : vector<1x1x1x32xf32> to vector<1x1x1x32xf32>
    %71 = vector.broadcast %70 : vector<1x1x1x32xf32> to vector<1x2x2x32xf32>
    %72 = tpu.concatenate %66, %71 in 2 : vector<1x2x2x32xf32>, vector<1x2x2x32xf32> -> vector<1x2x4x32xf32>
    %cst_9 = arith.constant 1.562500e-02 : f32
    %73 = vector.broadcast %cst_9 : f32 to vector<1x32xf32>
    %74 = arith.mulf %52, %73 : vector<1x32xf32>
    %75 = vector.shape_cast %74 : vector<1x32xf32> to vector<1x1x1x32xf32>
    %76 = vector.shape_cast %75 : vector<1x1x1x32xf32> to vector<1x1x1x32xf32>
    %77 = vector.broadcast %76 : vector<1x1x1x32xf32> to vector<1x2x2x32xf32>
    %cst_10 = arith.constant 1.562500e-02 : f32
    %78 = vector.broadcast %cst_10 : f32 to vector<1x32xf32>
    %79 = arith.mulf %53, %78 : vector<1x32xf32>
    %80 = vector.shape_cast %79 : vector<1x32xf32> to vector<1x1x1x32xf32>
    %81 = vector.shape_cast %80 : vector<1x1x1x32xf32> to vector<1x1x1x32xf32>
    %82 = vector.broadcast %81 : vector<1x1x1x32xf32> to vector<1x2x2x32xf32>
    %83 = tpu.concatenate %77, %82 in 2 : vector<1x2x2x32xf32>, vector<1x2x2x32xf32> -> vector<1x2x4x32xf32>
    %84 = tpu.concatenate %72, %83 in 1 : vector<1x2x4x32xf32>, vector<1x2x4x32xf32> -> vector<1x4x4x32xf32>
    %cst_11 = arith.constant 0.000000e+00 : f32
    %85 = vector.broadcast %cst_11 : f32 to vector<1x4x4x32xf32>
    %86 = tpu.concatenate %61, %84, %85 in 3 : vector<1x4x4x32xf32>, vector<1x4x4x32xf32>, vector<1x4x4x32xf32> -> vector<1x4x4x96xf32>
    %c0_12 = arith.constant 0 : index
    %c0_13 = arith.constant 0 : index
    %c0_14 = arith.constant 0 : index
    %c0_15 = arith.constant 0 : index
    %87 = vector.load %arg2[%c0_12, %c0_13, %c0_14, %c0_15] : memref<1x4x4x96xf32, #tpu.memory_space<vmem>>, vector<1x4x4x96xf32>
    tpu.vector_store %arg2[%c0_12, %c0_13, %c0_14, %c0_15], %86 {strides = array<i32>} : memref<1x4x4x96xf32, #tpu.memory_space<vmem>>, vector<1x4x4x96xf32>,
    return
  }
  func.func @transform_0(%arg0: i32) -> (i32, i32, i32) {
    %c0_i32 = arith.constant 0 : i32
    %c0_i32_0 = arith.constant 0 : i32
    %c0_i32_1 = arith.constant 0 : i32
    return %arg0, %c0_i32, %c0_i32_0 : i32, i32, i32
  }
  func.func @transform_1(%arg0: i32) -> (i32, i32, i32, i32) {
    %c0_i32 = arith.constant 0 : i32
    %c0_i32_0 = arith.constant 0 : i32
    %c0_i32_1 = arith.constant 0 : i32
    %c0_i32_2 = arith.constant 0 : i32
    return %arg0, %c0_i32, %c0_i32_0, %c0_i32_1 : i32, i32, i32, i32
  }
}

</mosaic_0001>

<bundles_post_ra>
// kernel: tpu_custom_call.1
= control target key start
LH: loop header
LB: loop body
LE: loop exit
PB: predicated region body
PF: predicated region fallthrough
CT: control target
= control target key end

     0   :  { %6 = vsyncpa [#allocation3], 0  ;;  %s2624_s0 = inlined_call_operand.hbm [shape: f32[2,8,128], index: 0, kind: input, shape index: {}]   ;;  %s2625_s1 = inlined_call_operand.hbm [shape: f32[2,4,4,96], index: 1, kind: output, shape index: {}]  }
   0x1   :  { %8 = vsyncpa [#allocation3 + $0x1], 0 }
   0x2   :  { %9 = vsyncpa [#allocation4], 0 }
   0x3   :  { %11 = vsyncpa [#allocation4 + $0x1], 0  ;;  %s2046_s6 = smov 0   ;;  %s2048_s7 = smov 0  }
   0x4   :  { %s2050_s8 = smov 0   ;;  %s2052_s9 = smov 0  }
   0x5 LB: > { %s2067_s10 = sadd.s32 4294967295, %s2026_s9   ;;  %s1494_s11 = sadd.s32 4294967294, %s2026_s9   ;;  %s2026_s9 = sphi %s2052_s9, %s2646_s9   ;;  %s2022_s8 = sphi %s2050_s8, %s2645_s8   ;;  %s2018_s7 = sphi %s2048_s7, %s2644_s7   ;;  %s2014_s6 = sphi %s2046_s6, %s2643_s6  }
   0x6   : > { %s2071_s12 = sadd.s32 1, %s2026_s9   ;;  %s24_s13 = sadd.s32 1, %s2022_s8 }
   0x7   : > { %s21_s14 = ssub.s32 %s2026_s9, %s2071_s12  ;;  %p31_p0 = scmp.ne.s32.totalorder %s2022_s8, %s2018_s7 }
   0x8   : > { %p22_p1 = scmp.eq.s32.totalorder %s21_s14, 0  ;;  %p32_p2 = scmp.eq.s32.totalorder %s2026_s9, 0 }
   0x9   : > { %p37_p3 = scmp.ne.s32.totalorder %s2018_s7, %s2014_s6  ;;  %p38_p4 = scmp.eq.s32.totalorder %s2067_s10, 0 }
   0xa   : > { %s2083_s15 = scalar_select %p22_p1, %s2022_s8, %s24_s13  }
   0xb   : > { %p2085_p5 = por %p32_p2, %p31_p0  ;;  %p2089_p6 = por %p38_p4, %p37_p3 }
   0xc   : > { %p61_p7 = scmp.eq.s32.totalorder %s2067_s10, 1  ;;  %p67_p8 = scmp.eq.s32.totalorder %s1494_s11, 1 }
   0xd   : > { %p1890_p10 = scmp.lt.s32.totalorder %s2026_s9, 2  ;;  %s87_s20 = sand.u32 1, %s2022_s8  }
   0xe   : > { %p2096_p11 = por %p61_p7, %p31_p0  ;;  %p2100_p12 = por %p67_p8, %p37_p3 }
   0xf   : > { %s1498_s21 = sshll.u32 %s2026_s9, 7  ;;  %s1497_s22 = sshll.u32 %s87_s20, 3 }
  0x10   : > { %s2629_s18 = scalar_select %p2096_p11, 1, 0 }
  0x11   : > { %s2630_s19 = scalar_select %p2100_p12, 1, 0 }
  0x12   : > { %s2109_s25 = scalar_lea.hbm %s2624_s0, %s1498_s21  ;;  %s91_s26 = scalar_lea.vmem [#allocation2], %s1497_s22 }
  0x13   : > { %s98_s27 = sshll.u32 %s91_s26, 4  ;;  %p2113_p13 = pnand %p1890_p10, %p2085_p5  ;;  %s2117_s27 = int_to_ptr.vmem [resolvable:$true] %s98_s27 }
  0x14   : > { %s88_s29 = scalar_lea.sflag [#allocation3], %s87_s20  ;;  %s1930_s30 = scalar_lea.hbm %s2109_s25, 128 }
  0x15   : > { %p1931_p2 = scmp.ne.s32.totalorder %s2109_s25, %s1930_s30  ;;  %p1932_p3 = pneg %p2113_p13 }
  0x16   : > { %s1935_s4 = scalar_lea.hbm %s2624_s0, 256  ;;  %p1936_p5 = scmp.lt.u32.totalorder %s2109_s25, %s2624_s0 }
  0x17   : > { %p1933_p4 = pnand %p1932_p3, %p1931_p2  ;;  %p1937_p8 = scmp.lt.u32.totalorder %s1935_s4, %s1930_s30 }
  0x18   : > { %p1939_p9 = scmp.lt.u32.totalorder %s1930_s30, %s2109_s25 }
  0x19   : > { %p1934_p7 = pneg %p1933_p4  ;;  %p1938_p10 = por %p1937_p8, %p1936_p5 }
  0x1b   : > { %p1940_p0 = por %p1939_p9, %p1938_p10 }
  0x1d   : > { %p1941_p1 = pnand %p1940_p0, %p1934_p7 }
  0x1f   : > { %1944 = shalt.err (!%p1941_p1)
}
  0x20   : > { %s1945_s13 = scalar_lea.vmem %s2117_s27, 128  ;;  %s2028_s14 = smov [#allocation2]  }
  0x21   : > { %p1946_p2 = scmp.ne.s32.totalorder %s2117_s27, %s1945_s13  ;;  %s1950_s16 = sshll.u32 %s2028_s14, 4  ;;  %s1951_s16 = int_to_ptr.vmem [resolvable:$false] %s1950_s16 }
  0x22   : > { %s1952_s20 = scalar_lea.vmem %s1951_s16, 256  ;;  %p1953_p11 = scmp.lt.s32.totalorder %s2117_s27, %s1951_s16 }
  0x23   : > { %p1948_p4 = pnand %p1946_p2, %p1932_p3  ;;  %p1954_p5 = scmp.lt.s32.totalorder %s1952_s20, %s1945_s13 }
  0x25   : > { %p1949_p12 = pneg %p1948_p4  ;;  %p1955_p8 = por %p1954_p5, %p1953_p11 }
  0x27   : > { %p1956_p9 = pnand %p1955_p8, %p1949_p12 }
  0x29   : > { %1959 = shalt.err (!%p1956_p9)
}
  0x2a   : > { %1885 = dma.hbm_to_vmem [thread:$0]  (!%p2113_p13), %s2109_s25, 128, %s2117_s27, %s88_s29  }
  0x2b   : > { %p2632_p0 = scmp.lt.s32.totalorder %s2026_s9, 3  ;;  %p2633_p1 = scmp.ge.s32.totalorder %s2026_s9, 1 }
  0x2d   : > { %p104_p3 = pnand %p2633_p1, %p2632_p0 }
  0x2e   : > { %s2151_s21 = sand.u32 (!%p104_p3), 1, %s2018_s7  }
  0x2f   : > { %107 = sbr.rel (%p104_p3) target bundleno = 1028 (0x404), region = 24  ;;  %s1500_s22 = sshll.u32 (!%p104_p3), %s2151_s21, 3 }
  0x30   : > { %s110_s23 = scalar_lea.sflag (!%p104_p3), [#allocation3], %s2151_s21  ;;  %s113_s24 = scalar_lea.vmem (!%p104_p3), [#allocation2], %s1500_s22 }
  0x36   : > { %2005 = dma.done.wait (%p2089_p6), %s110_s23, 128  }
  0x37   : > { %2007 = vsyncadd (%p2089_p6), %s110_s23, 4294967168  ;;  %v142_v0 = vlaneseq  ;;  %v2029_v2 = vmov 0   ;;  %v133_v6 = vld [vmem:[%s113_s24] sm:$0xff]  ;;  %v2030_v35 = vmov 1.0|1.0   ;;  %s2031_s17 = smov 96  }
  0x38   : > { %v137_v8 = vmul.f32 32.0, %v133_v6  ;;  %vm134_vm3 = vcmp.ge.f32.partialorder %v133_v6, 0.0  ;;  %vm135_vm4 = vcmp.le.f32.partialorder %v133_v6, 1.0  ;;  %s2032_s25 = smov 32   ;;  %s2033_s26 = smov 64  }
  0x39   : > { %v2160_v1 = vshrl.u32 %v142_v0, 7  ;;  %vm136_vm6 = vmand %vm134_vm3, %vm135_vm4  ;;  %v2227_v25 = vand.u32 127, %v142_v0  ;;  %s1501_s27 = sshll.u32 %s2151_s21, 4  ;;  %s1787_s30 = sshll.u32 %s2067_s10, 8 }
  0x3a   : > { %v138_v9 = vfloor.f32 %v137_v8  ;;  %s131_s28 = scalar_lea.vmem [#allocation5], %s1501_s27  ;;  %s2578_s4 = scalar_lea.hbm %s2625_s1, %s1787_s30 }
  0x3b   : > { %vm144_vm0 = vcmp.ge.s32.totalorder %v2160_v1, 2  ;;  %vm146_vm1 = vcmp.ge.s32.totalorder %v2160_v1, 4  ;;  %vm149_vm2 = vcmp.ge.s32.totalorder %v2160_v1, 6  ;;  %v2166_v15 = vsub.s32 0, %v2160_v1  ;;  %s1421_s29 = sshll.u32 %s131_s28, 4  ;;  %s1408_s5 = scalar_lea.sflag [#allocation4], %s2151_s21  ;;  %s2573_s29 = int_to_ptr.vmem [resolvable:$true] %s1421_s29 }
  0x3c   : > { %v145_v3 = vsel %vm144_vm0, 1, %v2029_v2  ;;  %v147_v4 = vsel %vm146_vm1, 1, %v2029_v2  ;;  %v150_v7 = vsel %vm149_vm2, 1, %v2029_v2  ;;  %v1876_v11 = vtrunc.f32 %v138_v9  ;;  %s1960_s11 = scalar_lea.vmem %s2573_s29, 256  ;;  %p2640_p11 = scmp.ne.s32.totalorder %s2629_s18, 0 }
  0x3d   : > { %v148_v5 = vadd.s32 %v147_v4, %v145_v3  ;;  %v226_v16 = vsub.s32 1, %v2160_v1  ;;  %v360_v21 = vsub.s32 3, %v2160_v1  ;;  %v293_v22 = vsub.s32 2, %v2160_v1  ;;  %p1961_p6 = scmp.ne.s32.totalorder %s2573_s29, %s1960_s11  ;;  %s2034_s10 = smov [#allocation5]  }
  0x3e   : > { %v1877_v12 = vcvt.f32.s32 %v1876_v11  ;;  %v2230_v28 = vmul.u32 1024, %v2160_v1  ;;  %v1141_v29 = vadd.s32 128, %v2227_v25  ;;  %v494_v34 = vsub.s32 5, %v2160_v1  ;;  %s1964_s13 = sshll.u32 %s2034_s10, 4  ;;  %s1965_s13 = int_to_ptr.vmem [resolvable:$false] %s1964_s13 }
  0x3f   : > { %v151_v10 = vadd.s32 %v150_v7, %v148_v5  ;;  %v427_v38 = vsub.s32 4, %v2160_v1  ;;  %v1143_v40 = vadd.s32 384, %v2227_v25  ;;  %v628_v44 = vsub.s32 7, %v2160_v1  ;;  %p1962_p12 = pnand %p1961_p6, %p2640_p11  ;;  %s1966_s14 = scalar_lea.vmem %s1965_s13, 512 }
  0x40   : > { %vm140_vm5 = vcmp.lt.s32.totalorder %v1877_v12, 31  ;;  %v2236_v30 = vadd.s32 1024, %v2230_v28  ;;  %vm1150_vm7 = vcmp.ge.s32.totalorder %v1141_v29, %v2230_v28  ;;  %v561_v47 = vsub.s32 6, %v2160_v1  ;;  %p1967_p7 = scmp.lt.s32.totalorder %s2573_s29, %s1965_s13  ;;  %p1968_p10 = scmp.lt.s32.totalorder %s1966_s14, %s1960_s11 }
  0x41   : > { %v152_v13 = vmul.u32 32, %v151_v10  ;;  %v141_v14 = vsel %vm140_vm5, %v1877_v12, 31  ;;  %vm1152_vm4 = vcmp.ge.s32.totalorder %v1143_v40, %v2230_v28  ;;  %p1963_p13 = pneg %p1962_p12 }
  0x42   : > { %vm1159_vm8 = vcmp.lt.s32.totalorder %v1141_v29, %v2236_v30  ;;  %vm1161_vm5 = vcmp.lt.s32.totalorder %v1143_v40, %v2236_v30  ;;  %p1969_p2 = por %p1968_p10, %p1967_p7 }
  0x43   : > { %v153_v17 = vadd.s32 %v152_v13, %v141_v14  ;;  %vm2243_vm12 = vmand %vm1150_vm7, %vm1159_vm8 }
  0x44   : > { %vm1670_vm0 = vmpackc.low %vm2243_vm12, %vm2243_vm12  ;;  %p1970_p4 = pnand %p1969_p2, %p1963_p13 }
  0x45   : > { %v2169_v18 = vsel %vm136_vm6, %v153_v17, 4294967295  ;;  %1671 = vmatprep.mubr.msk.bf16.mxu0 %vm1670_vm0, %v2030_v35  ;;  %vm1169_vm8 = vmand %vm1152_vm4, %vm1161_vm5 }
  0x46   : > { %v2173_v19 = vrot.slane %v2169_v18, %v2166_v15  ;;  %v227_v20 = vrot.slane %v2169_v18, %v226_v16  ;;  %v2180_v23 = vrot.slane %v2169_v18, %v360_v21  ;;  %v2184_v24 = vrot.slane %v2169_v18, %v293_v22 }
  0x47   : > { %v2261_v39 = vrot.slane %v2169_v18, %v494_v34  ;;  %v2272_v43 = vrot.slane %v2169_v18, %v427_v38  ;;  %v2283_v48 = vrot.slane %v2169_v18, %v628_v44  ;;  %v2291_v51 = vrot.slane %v2169_v18, %v561_v47 }
  0x48   : > { %229 = vbcast.lane.b32.xlu0 %v227_v20, 256  ;;  %162 = vbcast.lane.b32.xlu1 %v2173_v19, 256  ;;  %v1142_v44 = vadd.s32 256, %v2227_v25 }
  0x4c   : > { %233 = vbcast.lane.b32.xlu0 %v227_v20, 264  ;;  %166 = vbcast.lane.b32.xlu1 %v2173_v19, 264 }
  0x50   : > { %363 = vbcast.lane.b32.xlu0 %v2180_v23, 256  ;;  %367 = vbcast.lane.b32.xlu1 %v2180_v23, 264 }
  0x54   : > { %296 = vbcast.lane.b32.xlu0 %v2184_v24, 256  ;;  %300 = vbcast.lane.b32.xlu1 %v2184_v24, 264 }
  0x58   : > { %237 = vbcast.lane.b32.xlu0 %v227_v20, 272  ;;  %241 = vbcast.lane.b32.xlu1 %v227_v20, 280 }
  0x5c   : > { %170 = vbcast.lane.b32.xlu0 %v2173_v19, 272  ;;  %174 = vbcast.lane.b32.xlu1 %v2173_v19, 280 }
  0x60   : > { %371 = vbcast.lane.b32.xlu0 %v2180_v23, 272  ;;  %375 = vbcast.lane.b32.xlu1 %v2180_v23, 280 }
  0x64   : > { %304 = vbcast.lane.b32.xlu0 %v2184_v24, 272  ;;  %308 = vbcast.lane.b32.xlu1 %v2184_v24, 280 }
  0x68   : > { %245 = vbcast.lane.b32.xlu0 %v227_v20, 288  ;;  %249 = vbcast.lane.b32.xlu1 %v227_v20, 296 }
  0x6c   : > { %178 = vbcast.lane.b32.xlu0 %v2173_v19, 288  ;;  %182 = vbcast.lane.b32.xlu1 %v2173_v19, 296 }
  0x70   : > { %379 = vbcast.lane.b32.xlu0 %v2180_v23, 288  ;;  %383 = vbcast.lane.b32.xlu1 %v2180_v23, 296 }
  0x74   : > { %312 = vbcast.lane.b32.xlu0 %v2184_v24, 288  ;;  %316 = vbcast.lane.b32.xlu1 %v2184_v24, 296 }
  0x78   : > { %253 = vbcast.lane.b32.xlu0 %v227_v20, 304  ;;  %257 = vbcast.lane.b32.xlu1 %v227_v20, 312 }
  0x7c   : > { %186 = vbcast.lane.b32.xlu0 %v2173_v19, 304  ;;  %190 = vbcast.lane.b32.xlu1 %v2173_v19, 312 }
  0x80   : > { %387 = vbcast.lane.b32.xlu0 %v2180_v23, 304  ;;  %391 = vbcast.lane.b32.xlu1 %v2180_v23, 312 }
  0x84   : > { %320 = vbcast.lane.b32.xlu0 %v2184_v24, 304  ;;  %324 = vbcast.lane.b32.xlu1 %v2184_v24, 312 }
  0x88   : > { %261 = vbcast.lane.b32.xlu0 %v227_v20, 320  ;;  %265 = vbcast.lane.b32.xlu1 %v227_v20, 328 }
  0x8c   : > { %194 = vbcast.lane.b32.xlu0 %v2173_v19, 320  ;;  %198 = vbcast.lane.b32.xlu1 %v2173_v19, 328 }
  0x90   : > { %395 = vbcast.lane.b32.xlu0 %v2180_v23, 320  ;;  %399 = vbcast.lane.b32.xlu1 %v2180_v23, 328 }
  0x94   : > { %328 = vbcast.lane.b32.xlu0 %v2184_v24, 320  ;;  %332 = vbcast.lane.b32.xlu1 %v2184_v24, 328 }
  0x98   : > { %269 = vbcast.lane.b32.xlu0 %v227_v20, 336  ;;  %273 = vbcast.lane.b32.xlu1 %v227_v20, 344 }
  0x9c   : > { %202 = vbcast.lane.b32.xlu0 %v2173_v19, 336  ;;  %206 = vbcast.lane.b32.xlu1 %v2173_v19, 344 }
  0xa0   : > { %403 = vbcast.lane.b32.xlu0 %v2180_v23, 336  ;;  %407 = vbcast.lane.b32.xlu1 %v2180_v23, 344 }
  0xa4   : > { %336 = vbcast.lane.b32.xlu0 %v2184_v24, 336  ;;  %340 = vbcast.lane.b32.xlu1 %v2184_v24, 344 }
  0xa8   : > { %277 = vbcast.lane.b32.xlu0 %v227_v20, 352  ;;  %281 = vbcast.lane.b32.xlu1 %v227_v20, 360 }
  0xac   : > { %210 = vbcast.lane.b32.xlu0 %v2173_v19, 352  ;;  %214 = vbcast.lane.b32.xlu1 %v2173_v19, 360 }
  0xb0   : > { %411 = vbcast.lane.b32.xlu0 %v2180_v23, 352  ;;  %415 = vbcast.lane.b32.xlu1 %v2180_v23, 360 }
  0xb4   : > { %344 = vbcast.lane.b32.xlu0 %v2184_v24, 352  ;;  %348 = vbcast.lane.b32.xlu1 %v2184_v24, 360 }
  0xb8   : > { %285 = vbcast.lane.b32.xlu0 %v227_v20, 368  ;;  %289 = vbcast.lane.b32.xlu1 %v227_v20, 376 }
  0xba   : > { %v230_v26 = vpop.permute.xlu0 %229  ;;  %v163_v27 = vpop.permute.xlu1 %162 }
  0xbb   : > { %vm709_vm10 = vcmp.eq.s32.totalorder %v230_v26, %v2227_v25  ;;  %vm693_vm13 = vcmp.eq.s32.totalorder %v163_v27, %v2227_v25 }
  0xbc   : > { %218 = vbcast.lane.b32.xlu0 %v2173_v19, 368  ;;  %222 = vbcast.lane.b32.xlu1 %v2173_v19, 376 }
  0xbe   : > { %v234_v31 = vpop.permute.xlu0 %233  ;;  %v167_v32 = vpop.permute.xlu1 %166 }
  0xbf   : > { %vm694_vm9 = vcmp.eq.s32.totalorder %v167_v32, %v2227_v25  ;;  %vm710_vm11 = vcmp.eq.s32.totalorder %v234_v31, %v2227_v25 }
  0xc0   : > { %419 = vbcast.lane.b32.xlu0 %v2180_v23, 368  ;;  %423 = vbcast.lane.b32.xlu1 %v2180_v23, 376  ;;  %vm1654_vm14 = vmpackc.low %vm710_vm11, %vm709_vm10 }
  0xc1   : > { %1788 = vmatprep.subr.msk.bf16.mxu0 %vm1654_vm14, %v2030_v35  ;;  %vm1638_vm15 = vmpackc.low %vm694_vm9, %vm693_vm13 }
  0xc2   : > { %v364_v36 = vpop.permute.xlu0 %363  ;;  %1789 = vmatpush3.bf16.msk.msra.mxu0 %vm1638_vm15, %v2030_v35  ;;  %v368_v37 = vpop.permute.xlu1 %367  ;;  %vm1706_vm10 = vmpackc.low %vm1169_vm8, %vm1169_vm8 }
  0xc3   : > { %vm741_vm1 = vcmp.eq.s32.totalorder %v364_v36, %v2227_v25  ;;  %vm742_vm2 = vcmp.eq.s32.totalorder %v368_v37, %v2227_v25  ;;  %1707 = vmatprep.mubr.msk.bf16.mxu1 %vm1706_vm10, %v2030_v35 }
  0xc4   : > { %352 = vbcast.lane.b32.xlu0 %v2184_v24, 368  ;;  %356 = vbcast.lane.b32.xlu1 %v2184_v24, 376  ;;  %vm1690_vm3 = vmpackc.low %vm742_vm2, %vm741_vm1 }
  0xc5   : > { %1810 = vmatprep.subr.msk.bf16.mxu1 %vm1690_vm3, %v2030_v35 }
  0xc6   : > { %v297_v41 = vpop.permute.xlu0 %296  ;;  %v301_v42 = vpop.permute.xlu1 %300 }
  0xc7   : > { %vm725_vm6 = vcmp.eq.s32.totalorder %v297_v41, %v2227_v25  ;;  %vm726_vm7 = vcmp.eq.s32.totalorder %v301_v42, %v2227_v25 }
  0xc8   : > { %497 = vbcast.lane.b32.xlu0 %v2261_v39, 256  ;;  %501 = vbcast.lane.b32.xlu1 %v2261_v39, 264  ;;  %vm1674_vm9 = vmpackc.low %vm726_vm7, %vm725_vm6 }
  0xc9   : > { %1811 = vmatpush3.bf16.msk.msra.mxu1 %vm1674_vm9, %v2030_v35 }
  0xca   : > { %v238_v45 = vpop.permute.xlu0 %237  ;;  %v242_v46 = vpop.permute.xlu1 %241 }
  0xcb   : > { %vm711_vm11 = vcmp.eq.s32.totalorder %v238_v45, %v2227_v25  ;;  %vm712_vm12 = vcmp.eq.s32.totalorder %v242_v46, %v2227_v25  ;;  %v1145_v45 = vadd.s32 640, %v2227_v25 }
  0xcc   : > { %vm1656_vm13 = vmpackc.low %vm712_vm12, %vm711_vm11  ;;  %430 = vbcast.lane.b32.xlu0 %v2272_v43, 256  ;;  %434 = vbcast.lane.b32.xlu1 %v2272_v43, 264 }
  0xcd   : > { %1790 = vmatprep.subr.msk.bf16.mxu0 %vm1656_vm13, %v2030_v35 }
  0xce   : > { %v171_v49 = vpop.permute.xlu0 %170  ;;  %v175_v50 = vpop.permute.xlu1 %174 }
  0xcf   : > { %vm695_vm14 = vcmp.eq.s32.totalorder %v171_v49, %v2227_v25  ;;  %vm696_vm15 = vcmp.eq.s32.totalorder %v175_v50, %v2227_v25 }
  0xd0   : > { %vm1640_vm0 = vmpackc.low %vm696_vm15, %vm695_vm14  ;;  %631 = vbcast.lane.b32.xlu0 %v2283_v48, 256  ;;  %635 = vbcast.lane.b32.xlu1 %v2283_v48, 264 }
  0xd1   : > { %1791 = vmatpush3.bf16.msk.msra.mxu0 %vm1640_vm0, %v2030_v35 }
  0xd2   : > { %v372_v52 = vpop.permute.xlu0 %371  ;;  %v376_v53 = vpop.permute.xlu1 %375 }
  0xd3   : > { %vm743_vm1 = vcmp.eq.s32.totalorder %v372_v52, %v2227_v25  ;;  %vm744_vm2 = vcmp.eq.s32.totalorder %v376_v53, %v2227_v25  ;;  %v1147_v53 = vadd.s32 896, %v2227_v25 }
  0xd4   : > { %vm1692_vm3 = vmpackc.low %vm744_vm2, %vm743_vm1  ;;  %564 = vbcast.lane.b32.xlu0 %v2291_v51, 256  ;;  %568 = vbcast.lane.b32.xlu1 %v2291_v51, 264 }
  0xd5   : > { %1812 = vmatprep.subr.msk.bf16.mxu1 %vm1692_vm3, %v2030_v35 }
  0xd6   : > { %v305_v54 = vpop.permute.xlu0 %304  ;;  %v309_v55 = vpop.permute.xlu1 %308 }
  0xd7   : > { %vm727_vm4 = vcmp.eq.s32.totalorder %v305_v54, %v2227_v25  ;;  %vm728_vm5 = vcmp.eq.s32.totalorder %v309_v55, %v2227_v25 }
  0xd8   : > { %vm1676_vm6 = vmpackc.low %vm728_vm5, %vm727_vm4  ;;  %505 = vbcast.lane.b32.xlu0 %v2261_v39, 272  ;;  %509 = vbcast.lane.b32.xlu1 %v2261_v39, 280 }
  0xd9   : > { %1813 = vmatpush3.bf16.msk.msra.mxu1 %vm1676_vm6, %v2030_v35 }
  0xda   : > { %v246_v56 = vpop.permute.xlu0 %245  ;;  %v250_v57 = vpop.permute.xlu1 %249 }
  0xdb   : > { %vm713_vm7 = vcmp.eq.s32.totalorder %v246_v56, %v2227_v25  ;;  %vm714_vm8 = vcmp.eq.s32.totalorder %v250_v57, %v2227_v25 }
  0xdc   : > { %vm1658_vm9 = vmpackc.low %vm714_vm8, %vm713_vm7  ;;  %438 = vbcast.lane.b32.xlu0 %v2272_v43, 272  ;;  %442 = vbcast.lane.b32.xlu1 %v2272_v43, 280 }
  0xdd   : > { %1792 = vmatprep.subr.msk.bf16.mxu0 %vm1658_vm9, %v2030_v35 }
  0xde   : > { %v179_v58 = vpop.permute.xlu0 %178  ;;  %v183_v59 = vpop.permute.xlu1 %182 }
  0xdf   : > { %vm697_vm10 = vcmp.eq.s32.totalorder %v179_v58, %v2227_v25  ;;  %vm698_vm11 = vcmp.eq.s32.totalorder %v183_v59, %v2227_v25 }
  0xe0   : > { %vm1642_vm12 = vmpackc.low %vm698_vm11, %vm697_vm10  ;;  %639 = vbcast.lane.b32.xlu0 %v2283_v48, 272  ;;  %643 = vbcast.lane.b32.xlu1 %v2283_v48, 280 }
  0xe1   : > { %1793 = vmatpush3.bf16.msk.msra.mxu0 %vm1642_vm12, %v2030_v35 }
  0xe2   : > { %v380_v60 = vpop.permute.xlu0 %379  ;;  %v384_v61 = vpop.permute.xlu1 %383 }
  0xe3   : > { %vm745_vm13 = vcmp.eq.s32.totalorder %v380_v60, %v2227_v25  ;;  %vm746_vm14 = vcmp.eq.s32.totalorder %v384_v61, %v2227_v25 }
  0xe4   : > { %vm1694_vm15 = vmpackc.low %vm746_vm14, %vm745_vm13  ;;  %572 = vbcast.lane.b32.xlu0 %v2291_v51, 272  ;;  %576 = vbcast.lane.b32.xlu1 %v2291_v51, 280 }
  0xe5   : > { %1814 = vmatprep.subr.msk.bf16.mxu1 %vm1694_vm15, %v2030_v35 }
  0xe6   : > { %v313_v62 = vpop.permute.xlu0 %312  ;;  %v317_v63 = vpop.permute.xlu1 %316 }
  0xe7   : > { %vm729_vm0 = vcmp.eq.s32.totalorder %v313_v62, %v2227_v25  ;;  %vm730_vm1 = vcmp.eq.s32.totalorder %v317_v63, %v2227_v25 }
  0xe8   : > { %vm1678_vm2 = vmpackc.low %vm730_vm1, %vm729_vm0  ;;  %513 = vbcast.lane.b32.xlu0 %v2261_v39, 288  ;;  %517 = vbcast.lane.b32.xlu1 %v2261_v39, 296 }
  0xe9   : > { %1815 = vmatpush3.bf16.msk.msra.mxu1 %vm1678_vm2, %v2030_v35 }
  0xea   : > { %v254_v0 = vpop.permute.xlu0 %253  ;;  %v258_v1 = vpop.permute.xlu1 %257 }
  0xeb   : > { %vm715_vm3 = vcmp.eq.s32.totalorder %v254_v0, %v2227_v25  ;;  %vm716_vm4 = vcmp.eq.s32.totalorder %v258_v1, %v2227_v25 }
  0xec   : > { %vm1660_vm5 = vmpackc.low %vm716_vm4, %vm715_vm3  ;;  %446 = vbcast.lane.b32.xlu0 %v2272_v43, 288  ;;  %450 = vbcast.lane.b32.xlu1 %v2272_v43, 296 }
  0xed   : > { %1794 = vmatprep.subr.msk.bf16.mxu0 %vm1660_vm5, %v2030_v35 }
  0xee   : > { %v187_v2 = vpop.permute.xlu0 %186  ;;  %v191_v3 = vpop.permute.xlu1 %190 }
  0xef   : > { %vm699_vm6 = vcmp.eq.s32.totalorder %v187_v2, %v2227_v25  ;;  %vm700_vm7 = vcmp.eq.s32.totalorder %v191_v3, %v2227_v25 }
  0xf0   : > { %vm1644_vm8 = vmpackc.low %vm700_vm7, %vm699_vm6  ;;  %647 = vbcast.lane.b32.xlu0 %v2283_v48, 288  ;;  %651 = vbcast.lane.b32.xlu1 %v2283_v48, 296 }
  0xf1   : > { %1795 = vmatpush3.bf16.msk.msra.mxu0 %vm1644_vm8, %v2030_v35 }
  0xf2   : > { %v388_v4 = vpop.permute.xlu0 %387  ;;  %v392_v5 = vpop.permute.xlu1 %391 }
  0xf3   : > { %vm747_vm9 = vcmp.eq.s32.totalorder %v388_v4, %v2227_v25  ;;  %vm748_vm10 = vcmp.eq.s32.totalorder %v392_v5, %v2227_v25 }
  0xf4   : > { %vm1696_vm11 = vmpackc.low %vm748_vm10, %vm747_vm9  ;;  %580 = vbcast.lane.b32.xlu0 %v2291_v51, 288  ;;  %584 = vbcast.lane.b32.xlu1 %v2291_v51, 296 }
  0xf5   : > { %1816 = vmatprep.subr.msk.bf16.mxu1 %vm1696_vm11, %v2030_v35 }
  0xf6   : > { %v321_v6 = vpop.permute.xlu0 %320  ;;  %v325_v7 = vpop.permute.xlu1 %324 }
  0xf7   : > { %vm731_vm12 = vcmp.eq.s32.totalorder %v321_v6, %v2227_v25  ;;  %vm732_vm13 = vcmp.eq.s32.totalorder %v325_v7, %v2227_v25 }
  0xf8   : > { %vm1680_vm14 = vmpackc.low %vm732_vm13, %vm731_vm12  ;;  %521 = vbcast.lane.b32.xlu0 %v2261_v39, 304  ;;  %525 = vbcast.lane.b32.xlu1 %v2261_v39, 312 }
  0xf9   : > { %1817 = vmatpush3.bf16.msk.msra.mxu1 %vm1680_vm14, %v2030_v35 }
  0xfa   : > { %v262_v8 = vpop.permute.xlu0 %261  ;;  %v266_v9 = vpop.permute.xlu1 %265 }
  0xfb   : > { %vm717_vm15 = vcmp.eq.s32.totalorder %v262_v8, %v2227_v25  ;;  %vm718_vm0 = vcmp.eq.s32.totalorder %v266_v9, %v2227_v25 }
  0xfc   : > { %vm1662_vm1 = vmpackc.low %vm718_vm0, %vm717_vm15  ;;  %454 = vbcast.lane.b32.xlu0 %v2272_v43, 304  ;;  %458 = vbcast.lane.b32.xlu1 %v2272_v43, 312 }
  0xfd   : > { %1796 = vmatprep.subr.msk.bf16.mxu0 %vm1662_vm1, %v2030_v35 }
  0xfe   : > { %v195_v10 = vpop.permute.xlu0 %194  ;;  %v199_v11 = vpop.permute.xlu1 %198 }
  0xff   : > { %vm701_vm2 = vcmp.eq.s32.totalorder %v195_v10, %v2227_v25  ;;  %vm702_vm3 = vcmp.eq.s32.totalorder %v199_v11, %v2227_v25 }
 0x100   : > { %vm1646_vm4 = vmpackc.low %vm702_vm3, %vm701_vm2  ;;  %655 = vbcast.lane.b32.xlu0 %v2283_v48, 304  ;;  %659 = vbcast.lane.b32.xlu1 %v2283_v48, 312 }
 0x101   : > { %1797 = vmatpush3.bf16.msk.msra.mxu0 %vm1646_vm4, %v2030_v35 }
 0x102   : > { %v396_v12 = vpop.permute.xlu0 %395  ;;  %v400_v13 = vpop.permute.xlu1 %399 }
 0x103   : > { %vm749_vm5 = vcmp.eq.s32.totalorder %v396_v12, %v2227_v25  ;;  %vm750_vm6 = vcmp.eq.s32.totalorder %v400_v13, %v2227_v25 }
 0x104   : > { %vm1698_vm7 = vmpackc.low %vm750_vm6, %vm749_vm5  ;;  %588 = vbcast.lane.b32.xlu0 %v2291_v51, 304  ;;  %592 = vbcast.lane.b32.xlu1 %v2291_v51, 312 }
 0x105   : > { %1818 = vmatprep.subr.msk.bf16.mxu1 %vm1698_vm7, %v2030_v35 }
 0x106   : > { %v329_v14 = vpop.permute.xlu0 %328  ;;  %v333_v16 = vpop.permute.xlu1 %332 }
 0x107   : > { %vm733_vm8 = vcmp.eq.s32.totalorder %v329_v14, %v2227_v25  ;;  %vm734_vm9 = vcmp.eq.s32.totalorder %v333_v16, %v2227_v25 }
 0x108   : > { %vm1682_vm10 = vmpackc.low %vm734_vm9, %vm733_vm8  ;;  %529 = vbcast.lane.b32.xlu0 %v2261_v39, 320  ;;  %533 = vbcast.lane.b32.xlu1 %v2261_v39, 328 }
 0x109   : > { %1819 = vmatpush3.bf16.msk.msra.mxu1 %vm1682_vm10, %v2030_v35 }
 0x10a   : > { %v270_v17 = vpop.permute.xlu0 %269  ;;  %v274_v18 = vpop.permute.xlu1 %273 }
 0x10b   : > { %vm719_vm11 = vcmp.eq.s32.totalorder %v270_v17, %v2227_v25  ;;  %vm720_vm12 = vcmp.eq.s32.totalorder %v274_v18, %v2227_v25 }
 0x10c   : > { %vm1664_vm13 = vmpackc.low %vm720_vm12, %vm719_vm11  ;;  %462 = vbcast.lane.b32.xlu0 %v2272_v43, 320  ;;  %466 = vbcast.lane.b32.xlu1 %v2272_v43, 328 }
 0x10d   : > { %1798 = vmatprep.subr.msk.bf16.mxu0 %vm1664_vm13, %v2030_v35 }
 0x10e   : > { %v203_v19 = vpop.permute.xlu0 %202  ;;  %v207_v20 = vpop.permute.xlu1 %206 }
 0x10f   : > { %vm703_vm14 = vcmp.eq.s32.totalorder %v203_v19, %v2227_v25  ;;  %vm704_vm15 = vcmp.eq.s32.totalorder %v207_v20, %v2227_v25 }
 0x110   : > { %vm1648_vm0 = vmpackc.low %vm704_vm15, %vm703_vm14  ;;  %663 = vbcast.lane.b32.xlu0 %v2283_v48, 320  ;;  %667 = vbcast.lane.b32.xlu1 %v2283_v48, 328 }
 0x111   : > { %1799 = vmatpush3.bf16.msk.msra.mxu0 %vm1648_vm0, %v2030_v35 }
 0x112   : > { %v404_v21 = vpop.permute.xlu0 %403  ;;  %v408_v22 = vpop.permute.xlu1 %407 }
 0x113   : > { %vm751_vm1 = vcmp.eq.s32.totalorder %v404_v21, %v2227_v25  ;;  %vm752_vm2 = vcmp.eq.s32.totalorder %v408_v22, %v2227_v25 }
 0x114   : > { %vm1700_vm3 = vmpackc.low %vm752_vm2, %vm751_vm1  ;;  %596 = vbcast.lane.b32.xlu0 %v2291_v51, 320  ;;  %600 = vbcast.lane.b32.xlu1 %v2291_v51, 328 }
 0x115   : > { %1820 = vmatprep.subr.msk.bf16.mxu1 %vm1700_vm3, %v2030_v35 }
 0x116   : > { %v337_v23 = vpop.permute.xlu0 %336  ;;  %v341_v24 = vpop.permute.xlu1 %340 }
 0x117   : > { %vm735_vm4 = vcmp.eq.s32.totalorder %v337_v23, %v2227_v25  ;;  %vm736_vm5 = vcmp.eq.s32.totalorder %v341_v24, %v2227_v25 }
 0x118   : > { %vm1684_vm6 = vmpackc.low %vm736_vm5, %vm735_vm4  ;;  %537 = vbcast.lane.b32.xlu0 %v2261_v39, 336  ;;  %541 = vbcast.lane.b32.xlu1 %v2261_v39, 344  ;;  %vm1149_vm5 = vcmp.ge.s32.totalorder %v2227_v25, %v2230_v28 }
 0x119   : > { %1821 = vmatpush3.bf16.msk.msra.mxu1 %vm1684_vm6, %v2030_v35  ;;  %vm1158_vm6 = vcmp.lt.s32.totalorder %v2227_v25, %v2236_v30 }
 0x11a   : > { %v278_v26 = vpop.permute.xlu0 %277  ;;  %v282_v27 = vpop.permute.xlu1 %281 }
 0x11b   : > { %vm721_vm7 = vcmp.eq.s32.totalorder %v278_v26, %v2227_v25  ;;  %vm722_vm8 = vcmp.eq.s32.totalorder %v282_v27, %v2227_v25 }
 0x11c   : > { %vm1666_vm9 = vmpackc.low %vm722_vm8, %vm721_vm7  ;;  %470 = vbcast.lane.b32.xlu0 %v2272_v43, 336  ;;  %474 = vbcast.lane.b32.xlu1 %v2272_v43, 344 }
 0x11d   : > { %1800 = vmatprep.subr.msk.bf16.mxu0 %vm1666_vm9, %v2030_v35  ;;  %vm2415_vm8 = vmand %vm1149_vm5, %vm1158_vm6 }
 0x11e   : > { %v211_v29 = vpop.permute.xlu0 %210  ;;  %v215_v31 = vpop.permute.xlu1 %214 }
 0x11f   : > { %vm705_vm10 = vcmp.eq.s32.totalorder %v211_v29, %v2227_v25  ;;  %vm706_vm11 = vcmp.eq.s32.totalorder %v215_v31, %v2227_v25 }
 0x120   : > { %vm1650_vm12 = vmpackc.low %vm706_vm11, %vm705_vm10  ;;  %671 = vbcast.lane.b32.xlu0 %v2283_v48, 336  ;;  %675 = vbcast.lane.b32.xlu1 %v2283_v48, 344 }
 0x121   : > { %1801 = vmatpush3.bf16.msk.msra.mxu0 %vm1650_vm12, %v2030_v35  ;;  %vm1672_vm12 = vmpackc.low %vm2415_vm8, %vm2415_vm8 }
 0x122   : > { %v412_v32 = vpop.permute.xlu0 %411  ;;  %v416_v33 = vpop.permute.xlu1 %415 }
 0x123   : > { %vm753_vm13 = vcmp.eq.s32.totalorder %v412_v32, %v2227_v25  ;;  %vm754_vm14 = vcmp.eq.s32.totalorder %v416_v33, %v2227_v25 }
 0x124   : > { %vm1702_vm15 = vmpackc.low %vm754_vm14, %vm753_vm13  ;;  %604 = vbcast.lane.b32.xlu0 %v2291_v51, 336  ;;  %608 = vbcast.lane.b32.xlu1 %v2291_v51, 344  ;;  %vm1154_vm13 = vcmp.ge.s32.totalorder %v1145_v45, %v2230_v28  ;;  %vm1163_vm14 = vcmp.lt.s32.totalorder %v1145_v45, %v2236_v30 }
 0x125   : > { %1822 = vmatprep.subr.msk.bf16.mxu1 %vm1702_vm15, %v2030_v35  ;;  %vm1171_vm15 = vmand %vm1154_vm13, %vm1163_vm14 }
 0x126   : > { %v345_v34 = vpop.permute.xlu0 %344  ;;  %v349_v36 = vpop.permute.xlu1 %348 }
 0x127   : > { %vm737_vm0 = vcmp.eq.s32.totalorder %v345_v34, %v2227_v25  ;;  %vm738_vm1 = vcmp.eq.s32.totalorder %v349_v36, %v2227_v25 }
 0x128   : > { %vm1686_vm2 = vmpackc.low %vm738_vm1, %vm737_vm0  ;;  %545 = vbcast.lane.b32.xlu0 %v2261_v39, 352  ;;  %549 = vbcast.lane.b32.xlu1 %v2261_v39, 360 }
 0x129   : > { %1823 = vmatpush3.bf16.msk.msra.mxu1 %vm1686_vm2, %v2030_v35  ;;  %vm1151_vm2 = vcmp.ge.s32.totalorder %v1142_v44, %v2230_v28 }
 0x12a   : > { %v286_v37 = vpop.permute.xlu0 %285  ;;  %v290_v38 = vpop.permute.xlu1 %289 }
 0x12b   : > { %vm723_vm3 = vcmp.eq.s32.totalorder %v286_v37, %v2227_v25  ;;  %vm724_vm4 = vcmp.eq.s32.totalorder %v290_v38, %v2227_v25 }
 0x12c   : > { %vm1668_vm7 = vmpackc.low %vm724_vm4, %vm723_vm3  ;;  %478 = vbcast.lane.b32.xlu0 %v2272_v43, 352  ;;  %482 = vbcast.lane.b32.xlu1 %v2272_v43, 360  ;;  %vm1160_vm3 = vcmp.lt.s32.totalorder %v1142_v44, %v2236_v30 }
 0x12d   : > { %1802 = vmatprep.subr.msk.bf16.mxu0 %vm1668_vm7, %v2030_v35  ;;  %vm1742_vm4 = vmpackc.low %vm1171_vm15, %vm1171_vm15 }
 0x12e   : > { %v219_v40 = vpop.permute.xlu0 %218  ;;  %v223_v41 = vpop.permute.xlu1 %222  ;;  %vm2439_vm6 = vmand %vm1151_vm2, %vm1160_vm3 }
 0x12f   : > { %vm707_vm9 = vcmp.eq.s32.totalorder %v219_v40, %v2227_v25  ;;  %vm708_vm10 = vcmp.eq.s32.totalorder %v223_v41, %v2227_v25 }
 0x130   : > { %vm1652_vm11 = vmpackc.low %vm708_vm10, %vm707_vm9  ;;  %679 = vbcast.lane.b32.xlu0 %v2283_v48, 352  ;;  %683 = vbcast.lane.b32.xlu1 %v2283_v48, 360 }
 0x131   : > { %1803 = vmatpush3.bf16.msk.msra.mxu0 %vm1652_vm11, %v2030_v35  ;;  %vm1708_vm10 = vmpackc.low %vm2439_vm6, %vm2439_vm6  ;;  %vm1156_vm11 = vcmp.ge.s32.totalorder %v1147_v53, %v2230_v28 }
 0x132   : > { %v420_v46 = vpop.permute.xlu0 %419  ;;  %v424_v47 = vpop.permute.xlu1 %423 }
 0x133   : > { %vm755_vm0 = vcmp.eq.s32.totalorder %v420_v46, %v2227_v25  ;;  %vm756_vm1 = vcmp.eq.s32.totalorder %v424_v47, %v2227_v25 }
 0x134   : > { %vm1704_vm5 = vmpackc.low %vm756_vm1, %vm755_vm0  ;;  %612 = vbcast.lane.b32.xlu0 %v2291_v51, 352  ;;  %616 = vbcast.lane.b32.xlu1 %v2291_v51, 360 }
 0x135   : > { %1824 = vmatprep.subr.msk.bf16.mxu1 %vm1704_vm5, %v2030_v35  ;;  %1673 = vmatmul.mubr.msk.bf16.vlgmr.msra.gmra.mrb[0].mxu0 %vm1672_vm12, %v2030_v35  ;;  %vm1165_vm12 = vcmp.lt.s32.totalorder %v1147_v53, %v2236_v30 }
 0x136   : > { %v353_v49 = vpop.permute.xlu0 %352  ;;  %v357_v50 = vpop.permute.xlu1 %356  ;;  %1743 = vmatprep.mubr.msk.bf16.mxu0 %vm1742_vm4, %v2030_v35  ;;  %vm1173_vm13 = vmand %vm1156_vm11, %vm1165_vm12 }
 0x137   : > { %vm739_vm7 = vcmp.eq.s32.totalorder %v353_v49, %v2227_v25  ;;  %vm740_vm8 = vcmp.eq.s32.totalorder %v357_v50, %v2227_v25  ;;  %vm1778_vm0 = vmpackc.low %vm1173_vm13, %vm1173_vm13  ;;  %v1144_v50 = vadd.s32 512, %v2227_v25 }
 0x138   : > { %vm1688_vm9 = vmpackc.low %vm740_vm8, %vm739_vm7  ;;  %553 = vbcast.lane.b32.xlu0 %v2261_v39, 368  ;;  %557 = vbcast.lane.b32.xlu1 %v2261_v39, 376 }
 0x139   : > { %1825 = vmatpush3.bf16.msk.msra.mxu1 %vm1688_vm9, %v2030_v35 }
 0x13a   : > { %v498_v54 = vpop.permute.xlu0 %497  ;;  %v502_v55 = vpop.permute.xlu1 %501 }
 0x13b   : > { %vm773_vm14 = vcmp.eq.s32.totalorder %v498_v54, %v2227_v25  ;;  %vm774_vm15 = vcmp.eq.s32.totalorder %v502_v55, %v2227_v25 }
 0x13c   : > { %vm1726_vm1 = vmpackc.low %vm774_vm15, %vm773_vm14  ;;  %486 = vbcast.lane.b32.xlu0 %v2272_v43, 368  ;;  %490 = vbcast.lane.b32.xlu1 %v2272_v43, 376 }
 0x13d   : > { %1832 = vmatprep.subr.msk.bf16.mxu0 %vm1726_vm1, %v2030_v35  ;;  %1709 = vmatmul.mubr.msk.bf16.vlgmr.msra.gmra.mrb[0].mxu1 %vm1708_vm10, %v2030_v35 }
 0x13e   : > { %v431_v39 = vpop.permute.xlu0 %430  ;;  %v435_v56 = vpop.permute.xlu1 %434  ;;  %1779 = vmatprep.mubr.msk.bf16.mxu1 %vm1778_vm0, %v2030_v35 }
 0x13f   : > { %vm757_vm2 = vcmp.eq.s32.totalorder %v431_v39, %v2227_v25  ;;  %vm758_vm3 = vcmp.eq.s32.totalorder %v435_v56, %v2227_v25  ;;  %v1146_v39 = vadd.s32 768, %v2227_v25 }
 0x140   : > { %vm1710_vm4 = vmpackc.low %vm758_vm3, %vm757_vm2  ;;  %687 = vbcast.lane.b32.xlu0 %v2283_v48, 368  ;;  %691 = vbcast.lane.b32.xlu1 %v2283_v48, 376 }
 0x141   : > { %1833 = vmatpush3.bf16.msk.msra.mxu0 %vm1710_vm4, %v2030_v35 }
 0x142   : > { %v632_v43 = vpop.permute.xlu0 %631  ;;  %v636_v57 = vpop.permute.xlu1 %635 }
 0x143   : > { %vm805_vm5 = vcmp.eq.s32.totalorder %v632_v43, %v2227_v25  ;;  %vm806_vm6 = vcmp.eq.s32.totalorder %v636_v57, %v2227_v25 }
 0x144   : > { %vm1762_vm7 = vmpackc.low %vm806_vm6, %vm805_vm5  ;;  %620 = vbcast.lane.b32.xlu0 %v2291_v51, 368  ;;  %624 = vbcast.lane.b32.xlu1 %v2291_v51, 376 }
 0x145   : > { %1854 = vmatprep.subr.msk.bf16.mxu1 %vm1762_vm7, %v2030_v35 }
 0x146   : > { %v565_v58 = vpop.permute.xlu0 %564  ;;  %v569_v59 = vpop.permute.xlu1 %568 }
 0x147   : > { %vm789_vm8 = vcmp.eq.s32.totalorder %v565_v58, %v2227_v25  ;;  %vm790_vm9 = vcmp.eq.s32.totalorder %v569_v59, %v2227_v25 }
 0x148   : > { %vm1746_vm10 = vmpackc.low %vm790_vm9, %vm789_vm8 }
 0x149   : > { %1855 = vmatpush3.bf16.msk.msra.mxu1 %vm1746_vm10, %v2030_v35 }
 0x14a   : > { %v506_v48 = vpop.permute.xlu0 %505  ;;  %v510_v60 = vpop.permute.xlu1 %509 }
 0x14b   : > { %vm775_vm11 = vcmp.eq.s32.totalorder %v506_v48, %v2227_v25  ;;  %vm776_vm12 = vcmp.eq.s32.totalorder %v510_v60, %v2227_v25 }
 0x14c   : > { %vm1728_vm13 = vmpackc.low %vm776_vm12, %vm775_vm11 }
 0x14d   : > { %1834 = vmatprep.subr.msk.bf16.mxu0 %vm1728_vm13, %v2030_v35 }
 0x14e   : > { %v439_v51 = vpop.permute.xlu0 %438  ;;  %v443_v61 = vpop.permute.xlu1 %442 }
 0x14f   : > { %vm759_vm14 = vcmp.eq.s32.totalorder %v439_v51, %v2227_v25  ;;  %vm760_vm15 = vcmp.eq.s32.totalorder %v443_v61, %v2227_v25 }
 0x150   : > { %vm1712_vm0 = vmpackc.low %vm760_vm15, %vm759_vm14 }
 0x151   : > { %1835 = vmatpush3.bf16.msk.msra.mxu0 %vm1712_vm0, %v2030_v35 }
 0x152   : > { %v640_v62 = vpop.permute.xlu0 %639  ;;  %v644_v63 = vpop.permute.xlu1 %643 }
 0x153   : > { %vm807_vm1 = vcmp.eq.s32.totalorder %v640_v62, %v2227_v25  ;;  %vm808_vm2 = vcmp.eq.s32.totalorder %v644_v63, %v2227_v25 }
 0x154   : > { %vm1764_vm3 = vmpackc.low %vm808_vm2, %vm807_vm1 }
 0x155   : > { %1856 = vmatprep.subr.msk.bf16.mxu1 %vm1764_vm3, %v2030_v35 }
 0x156   : > { %v573_v0 = vpop.permute.xlu0 %572  ;;  %v577_v1 = vpop.permute.xlu1 %576 }
 0x157   : > { %vm791_vm4 = vcmp.eq.s32.totalorder %v573_v0, %v2227_v25  ;;  %vm792_vm5 = vcmp.eq.s32.totalorder %v577_v1, %v2227_v25 }
 0x158   : > { %vm1748_vm6 = vmpackc.low %vm792_vm5, %vm791_vm4 }
 0x159   : > { %1857 = vmatpush3.bf16.msk.msra.mxu1 %vm1748_vm6, %v2030_v35 }
 0x15a   : > { %v514_v2 = vpop.permute.xlu0 %513  ;;  %v518_v3 = vpop.permute.xlu1 %517 }
 0x15b   : > { %vm777_vm7 = vcmp.eq.s32.totalorder %v514_v2, %v2227_v25  ;;  %vm778_vm8 = vcmp.eq.s32.totalorder %v518_v3, %v2227_v25 }
 0x15c   : > { %vm1730_vm9 = vmpackc.low %vm778_vm8, %vm777_vm7 }
 0x15d   : > { %1836 = vmatprep.subr.msk.bf16.mxu0 %vm1730_vm9, %v2030_v35 }
 0x15e   : > { %v447_v4 = vpop.permute.xlu0 %446  ;;  %v451_v5 = vpop.permute.xlu1 %450 }
 0x15f   : > { %vm761_vm10 = vcmp.eq.s32.totalorder %v447_v4, %v2227_v25  ;;  %vm762_vm11 = vcmp.eq.s32.totalorder %v451_v5, %v2227_v25 }
 0x160   : > { %vm1714_vm12 = vmpackc.low %vm762_vm11, %vm761_vm10 }
 0x161   : > { %1837 = vmatpush3.bf16.msk.msra.mxu0 %vm1714_vm12, %v2030_v35 }
 0x162   : > { %v648_v6 = vpop.permute.xlu0 %647  ;;  %v652_v7 = vpop.permute.xlu1 %651 }
 0x163   : > { %vm809_vm13 = vcmp.eq.s32.totalorder %v648_v6, %v2227_v25  ;;  %vm810_vm14 = vcmp.eq.s32.totalorder %v652_v7, %v2227_v25 }
 0x164   : > { %vm1766_vm15 = vmpackc.low %vm810_vm14, %vm809_vm13 }
 0x165   : > { %1858 = vmatprep.subr.msk.bf16.mxu1 %vm1766_vm15, %v2030_v35 }
 0x166   : > { %v581_v8 = vpop.permute.xlu0 %580  ;;  %v585_v9 = vpop.permute.xlu1 %584 }
 0x167   : > { %vm793_vm0 = vcmp.eq.s32.totalorder %v581_v8, %v2227_v25  ;;  %vm794_vm1 = vcmp.eq.s32.totalorder %v585_v9, %v2227_v25 }
 0x168   : > { %vm1750_vm2 = vmpackc.low %vm794_vm1, %vm793_vm0 }
 0x169   : > { %1859 = vmatpush3.bf16.msk.msra.mxu1 %vm1750_vm2, %v2030_v35 }
 0x16a   : > { %v522_v10 = vpop.permute.xlu0 %521  ;;  %v526_v11 = vpop.permute.xlu1 %525 }
 0x16b   : > { %vm779_vm3 = vcmp.eq.s32.totalorder %v522_v10, %v2227_v25  ;;  %vm780_vm4 = vcmp.eq.s32.totalorder %v526_v11, %v2227_v25 }
 0x16c   : > { %vm1732_vm5 = vmpackc.low %vm780_vm4, %vm779_vm3 }
 0x16d   : > { %1838 = vmatprep.subr.msk.bf16.mxu0 %vm1732_vm5, %v2030_v35 }
 0x16e   : > { %v455_v12 = vpop.permute.xlu0 %454  ;;  %v459_v13 = vpop.permute.xlu1 %458 }
 0x16f   : > { %vm763_vm6 = vcmp.eq.s32.totalorder %v455_v12, %v2227_v25  ;;  %vm764_vm7 = vcmp.eq.s32.totalorder %v459_v13, %v2227_v25 }
 0x170   : > { %vm1716_vm8 = vmpackc.low %vm764_vm7, %vm763_vm6 }
 0x171   : > { %1839 = vmatpush3.bf16.msk.msra.mxu0 %vm1716_vm8, %v2030_v35 }
 0x172   : > { %v656_v14 = vpop.permute.xlu0 %655  ;;  %v660_v16 = vpop.permute.xlu1 %659 }
 0x173   : > { %vm811_vm9 = vcmp.eq.s32.totalorder %v656_v14, %v2227_v25  ;;  %vm812_vm10 = vcmp.eq.s32.totalorder %v660_v16, %v2227_v25 }
 0x174   : > { %vm1768_vm11 = vmpackc.low %vm812_vm10, %vm811_vm9 }
 0x175   : > { %1860 = vmatprep.subr.msk.bf16.mxu1 %vm1768_vm11, %v2030_v35 }
 0x176   : > { %v589_v17 = vpop.permute.xlu0 %588  ;;  %v593_v18 = vpop.permute.xlu1 %592 }
 0x177   : > { %vm795_vm12 = vcmp.eq.s32.totalorder %v589_v17, %v2227_v25  ;;  %vm796_vm13 = vcmp.eq.s32.totalorder %v593_v18, %v2227_v25 }
 0x178   : > { %vm1752_vm14 = vmpackc.low %vm796_vm13, %vm795_vm12 }
 0x179   : > { %1861 = vmatpush3.bf16.msk.msra.mxu1 %vm1752_vm14, %v2030_v35 }
 0x17a   : > { %v530_v19 = vpop.permute.xlu0 %529  ;;  %v534_v20 = vpop.permute.xlu1 %533 }
 0x17b   : > { %vm781_vm15 = vcmp.eq.s32.totalorder %v530_v19, %v2227_v25  ;;  %vm782_vm0 = vcmp.eq.s32.totalorder %v534_v20, %v2227_v25 }
 0x17c   : > { %vm1734_vm1 = vmpackc.low %vm782_vm0, %vm781_vm15 }
 0x17d   : > { %1840 = vmatprep.subr.msk.bf16.mxu0 %vm1734_vm1, %v2030_v35 }
 0x17e   : > { %v463_v21 = vpop.permute.xlu0 %462  ;;  %v467_v22 = vpop.permute.xlu1 %466 }
 0x17f   : > { %vm765_vm2 = vcmp.eq.s32.totalorder %v463_v21, %v2227_v25  ;;  %vm766_vm3 = vcmp.eq.s32.totalorder %v467_v22, %v2227_v25 }
 0x180   : > { %vm1718_vm4 = vmpackc.low %vm766_vm3, %vm765_vm2 }
 0x181   : > { %1841 = vmatpush3.bf16.msk.msra.mxu0 %vm1718_vm4, %v2030_v35 }
 0x182   : > { %v664_v23 = vpop.permute.xlu0 %663  ;;  %v668_v24 = vpop.permute.xlu1 %667 }
 0x183   : > { %vm813_vm5 = vcmp.eq.s32.totalorder %v664_v23, %v2227_v25  ;;  %vm814_vm6 = vcmp.eq.s32.totalorder %v668_v24, %v2227_v25 }
 0x184   : > { %vm1770_vm7 = vmpackc.low %vm814_vm6, %vm813_vm5 }
 0x185   : > { %1862 = vmatprep.subr.msk.bf16.mxu1 %vm1770_vm7, %v2030_v35 }
 0x186   : > { %v597_v26 = vpop.permute.xlu0 %596  ;;  %v601_v27 = vpop.permute.xlu1 %600 }
 0x187   : > { %vm797_vm8 = vcmp.eq.s32.totalorder %v597_v26, %v2227_v25  ;;  %vm798_vm9 = vcmp.eq.s32.totalorder %v601_v27, %v2227_v25 }
 0x188   : > { %vm1754_vm10 = vmpackc.low %vm798_vm9, %vm797_vm8 }
 0x189   : > { %1863 = vmatpush3.bf16.msk.msra.mxu1 %vm1754_vm10, %v2030_v35 }
 0x18a   : > { %v538_v29 = vpop.permute.xlu0 %537  ;;  %v542_v31 = vpop.permute.xlu1 %541 }
 0x18b   : > { %vm783_vm11 = vcmp.eq.s32.totalorder %v538_v29, %v2227_v25  ;;  %vm784_vm12 = vcmp.eq.s32.totalorder %v542_v31, %v2227_v25 }
 0x18c   : > { %vm1736_vm13 = vmpackc.low %vm784_vm12, %vm783_vm11 }
 0x18d   : > { %1842 = vmatprep.subr.msk.bf16.mxu0 %vm1736_vm13, %v2030_v35 }
 0x18e   : > { %v471_v32 = vpop.permute.xlu0 %470  ;;  %v475_v33 = vpop.permute.xlu1 %474 }
 0x18f   : > { %vm767_vm14 = vcmp.eq.s32.totalorder %v471_v32, %v2227_v25  ;;  %vm768_vm15 = vcmp.eq.s32.totalorder %v475_v33, %v2227_v25 }
 0x190   : > { %vm1720_vm0 = vmpackc.low %vm768_vm15, %vm767_vm14 }
 0x191   : > { %1843 = vmatpush3.bf16.msk.msra.mxu0 %vm1720_vm0, %v2030_v35 }
 0x192   : > { %v672_v34 = vpop.permute.xlu0 %671  ;;  %v676_v36 = vpop.permute.xlu1 %675 }
 0x193   : > { %vm815_vm1 = vcmp.eq.s32.totalorder %v672_v34, %v2227_v25  ;;  %vm816_vm2 = vcmp.eq.s32.totalorder %v676_v36, %v2227_v25 }
 0x194   : > { %vm1772_vm3 = vmpackc.low %vm816_vm2, %vm815_vm1 }
 0x195   : > { %1864 = vmatprep.subr.msk.bf16.mxu1 %vm1772_vm3, %v2030_v35 }
 0x196   : > { %v605_v37 = vpop.permute.xlu0 %604  ;;  %v609_v38 = vpop.permute.xlu1 %608 }
 0x197   : > { %vm799_vm4 = vcmp.eq.s32.totalorder %v605_v37, %v2227_v25  ;;  %vm800_vm5 = vcmp.eq.s32.totalorder %v609_v38, %v2227_v25 }
 0x198   : > { %vm1756_vm6 = vmpackc.low %vm800_vm5, %vm799_vm4  ;;  %vm1153_vm5 = vcmp.ge.s32.totalorder %v1144_v50, %v2230_v28 }
 0x199   : > { %1865 = vmatpush3.bf16.msk.msra.mxu1 %vm1756_vm6, %v2030_v35  ;;  %vm1162_vm6 = vcmp.lt.s32.totalorder %v1144_v50, %v2236_v30 }
 0x19a   : > { %v546_v40 = vpop.permute.xlu0 %545  ;;  %v550_v41 = vpop.permute.xlu1 %549 }
 0x19b   : > { %vm785_vm7 = vcmp.eq.s32.totalorder %v546_v40, %v2227_v25  ;;  %vm786_vm8 = vcmp.eq.s32.totalorder %v550_v41, %v2227_v25 }
 0x19c   : > { %vm1738_vm9 = vmpackc.low %vm786_vm8, %vm785_vm7 }
 0x19d   : > { %1844 = vmatprep.subr.msk.bf16.mxu0 %vm1738_vm9, %v2030_v35  ;;  %vm1170_vm8 = vmand %vm1153_vm5, %vm1162_vm6 }
 0x19e   : > { %v479_v42 = vpop.permute.xlu0 %478  ;;  %v483_v44 = vpop.permute.xlu1 %482 }
 0x19f   : > { %vm769_vm10 = vcmp.eq.s32.totalorder %v479_v42, %v2227_v25  ;;  %vm770_vm11 = vcmp.eq.s32.totalorder %v483_v44, %v2227_v25 }
 0x1a0   : > { %vm1722_vm12 = vmpackc.low %vm770_vm11, %vm769_vm10 }
 0x1a1   : > { %1845 = vmatpush3.bf16.msk.msra.mxu0 %vm1722_vm12, %v2030_v35  ;;  %vm1744_vm12 = vmpackc.low %vm1170_vm8, %vm1170_vm8  ;;  %vm1396_vm8 = vcmask 261120  }
 0x1a2   : > { %v680_v45 = vpop.permute.xlu0 %679  ;;  %v684_v46 = vpop.permute.xlu1 %683 }
 0x1a3   : > { %vm817_vm13 = vcmp.eq.s32.totalorder %v680_v45, %v2227_v25  ;;  %vm818_vm14 = vcmp.eq.s32.totalorder %v684_v46, %v2227_v25 }
 0x1a4   : > { %vm1774_vm15 = vmpackc.low %vm818_vm14, %vm817_vm13 }
 0x1a5   : > { %1866 = vmatprep.subr.msk.bf16.mxu1 %vm1774_vm15, %v2030_v35  ;;  %vm1155_vm15 = vcmp.ge.s32.totalorder %v1146_v39, %v2230_v28 }
 0x1a6   : > { %v613_v47 = vpop.permute.xlu0 %612  ;;  %v617_v49 = vpop.permute.xlu1 %616 }
 0x1a7   : > { %vm801_vm0 = vcmp.eq.s32.totalorder %v613_v47, %v2227_v25  ;;  %vm802_vm1 = vcmp.eq.s32.totalorder %v617_v49, %v2227_v25 }
 0x1a8   : > { %vm1758_vm2 = vmpackc.low %vm802_vm1, %vm801_vm0  ;;  %vm1164_vm0 = vcmp.lt.s32.totalorder %v1146_v39, %v2236_v30 }
 0x1a9   : > { %1867 = vmatpush3.bf16.msk.msra.mxu1 %vm1758_vm2, %v2030_v35  ;;  %vm1172_vm2 = vmand %vm1155_vm15, %vm1164_vm0 }
 0x1aa   : > { %v554_v52 = vpop.permute.xlu0 %553  ;;  %v558_v53 = vpop.permute.xlu1 %557  ;;  %vm1780_vm6 = vmpackc.low %vm1172_vm2, %vm1172_vm2 }
 0x1ab   : > { %vm787_vm3 = vcmp.eq.s32.totalorder %v554_v52, %v2227_v25  ;;  %vm788_vm4 = vcmp.eq.s32.totalorder %v558_v53, %v2227_v25 }
 0x1ac   : > { %vm1740_vm7 = vmpackc.low %vm788_vm4, %vm787_vm3 }
 0x1ad   : > { %1846 = vmatprep.subr.msk.bf16.mxu0 %vm1740_vm7, %v2030_v35  ;;  %vm1385_vm7 = vcmask 1041408  }
 0x1ae   : > { %v487_v54 = vpop.permute.xlu0 %486  ;;  %v491_v55 = vpop.permute.xlu1 %490 }
 0x1af   : > { %vm771_vm9 = vcmp.eq.s32.totalorder %v487_v54, %v2227_v25  ;;  %vm772_vm10 = vcmp.eq.s32.totalorder %v491_v55, %v2227_v25 }
 0x1b0   : > { %vm1724_vm11 = vmpackc.low %vm772_vm10, %vm771_vm9  ;;  %vm1399_vm9 = vcmask 523264   ;;  %vm1402_vm10 = vcmask 781312  }
 0x1b1   : > { %1847 = vmatpush3.bf16.msk.msra.mxu0 %vm1724_vm11, %v2030_v35 }
 0x1b2   : > { %v688_v56 = vpop.permute.xlu0 %687  ;;  %v692_v43 = vpop.permute.xlu1 %691 }
 0x1b3   : > { %vm819_vm13 = vcmp.eq.s32.totalorder %v688_v56, %v2227_v25  ;;  %vm820_vm14 = vcmp.eq.s32.totalorder %v692_v43, %v2227_v25 }
 0x1b4   : > { %vm1776_vm1 = vmpackc.low %vm820_vm14, %vm819_vm13  ;;  %1745 = vmatmul.mubr.msk.bf16.vlgmr.msra.gmra.mrb[4].mxu0 %vm1744_vm12, %v2030_v35 }
 0x1b5   : > { %1868 = vmatprep.subr.msk.bf16.mxu1 %vm1776_vm1, %v2030_v35 }
 0x1b6   : > { %v621_v57 = vpop.permute.xlu0 %620  ;;  %v625_v58 = vpop.permute.xlu1 %624 }
 0x1b7   : > { %vm803_vm3 = vcmp.eq.s32.totalorder %v621_v57, %v2227_v25  ;;  %vm804_vm4 = vcmp.eq.s32.totalorder %v625_v58, %v2227_v25 }
 0x1b8   : > { %vm1760_vm5 = vmpackc.low %vm804_vm4, %vm803_vm3 }
 0x1b9   : > { %1869 = vmatpush3.bf16.msk.msra.mxu1 %vm1760_vm5, %v2030_v35 }
 0x1bc   : > { %1781 = vmatmul.mubr.msk.bf16.vlgmr.msra.gmra.mrb[4].mxu1 %vm1780_vm6, %v2030_v35 }
 0x208   : > { %v1804_v28 = vpop.f32.mrb[0].mxu0 }
 0x209   : > { %v1805_v30 = vpop.f32.mrb[1].mxu0 }
 0x20a   : > { %v1806_v59 = vadd.f32 %v1805_v30, %v1804_v28  ;;  %v1807_v48 = vpop.f32.mrb[2].mxu0 }
 0x20b   : > { %v1808_v60 = vpop.f32.mrb[3].mxu0 }
 0x210   : > { %v1826_v51 = vpop.f32.mrb[0].mxu1 }
 0x211   : > { %v1827_v61 = vpop.f32.mrb[1].mxu1 }
 0x212   : > { %v1828_v62 = vadd.f32 %v1827_v61, %v1826_v51  ;;  %v1829_v63 = vpop.f32.mrb[2].mxu1 }
 0x213   : > { %v1830_v0 = vpop.f32.mrb[3].mxu1 }
 0x214   : > { %v1273_v1 = vadd.f32 %v1828_v62, %v1806_v59 }
 0x287   : > { %v1848_v2 = vpop.f32.mrb[4].mxu0 }
 0x288   : > { %v1849_v3 = vpop.f32.mrb[5].mxu0 }
 0x289   : > { %v1850_v25 = vadd.f32 %v1849_v3, %v1848_v2  ;;  %v1851_v4 = vpop.f32.mrb[6].mxu0 }
 0x28a   : > { %v1852_v5 = vpop.f32.mrb[7].mxu0 }
 0x28b   : > { %v1313_v6 = vadd.f32 %v1850_v25, %v1273_v1 }
 0x28f   : > { %v1870_v7 = vpop.f32.mrb[4].mxu1 }
 0x290   : > { %v1871_v8 = vpop.f32.mrb[5].mxu1 }
 0x291   : > { %v1872_v35 = vadd.f32 %v1871_v8, %v1870_v7  ;;  %v1873_v9 = vpop.f32.mrb[6].mxu1 }
 0x292   : > { %v1874_v10 = vpop.f32.mrb[7].mxu1 }
 0x293   : > { %v1353_v11 = vadd.f32 %v1872_v35, %v1313_v6 }
 0x295   : > { %v1376_v12 = vmul.f32 0.015625, %v1353_v11 }
 0x297   : > { %v1380_v13 = vrot.slane %v1376_v12, %v2166_v15 }
 0x299   : > { %1382 = vrot.lane.b32.xlu0 %v1380_v13, %s2031_s17 }
 0x29d   : > { %1359 = vrot.lane.b32.xlu0 %v1353_v11, %s2031_s17 }
 0x2a1   : > { %1367 = vrot.lane.b32.xlu0 %v1353_v11, %s2032_s25 }
 0x30b   : > { %v1383_v14 = vpop.permute.xlu0 %1382 }
 0x30c   : > { %v1386_v16 = vsel %vm1385_vm7, %v1380_v13, %v1383_v14 }
 0x30d   : > { %1388 = vrot.lane.b32.xlu1 %v1386_v16, %s2033_s26 }
 0x30f   : > { %v1360_v17 = vpop.permute.xlu0 %1359 }
 0x310   : > { %v1362_v19 = vadd.f32 %v1360_v17, %v1353_v11 }
 0x311   : > { %1363 = vrot.lane.b32.xlu1 %v1353_v11, %s2033_s26 }
 0x313   : > { %v1368_v22 = vpop.permute.xlu0 %1367 }
 0x315   : > { %1390 = vrot.lane.b32.xlu1 %v1386_v16, %s2032_s25 }
 0x37f   : > { %v1389_v18 = vpop.permute.xlu1 %1388 }
 0x380   : > { %1392 = vrot.lane.b32.xlu0 %v1389_v18, %s2032_s25 }
 0x383   : > { %v1364_v20 = vpop.permute.xlu1 %1363 }
 0x384   : > { %v1366_v21 = vadd.f32 %v1364_v20, %v1362_v19 }
 0x386   : > { %v1370_v23 = vadd.f32 %v1368_v22, %v1366_v21 }
 0x387   : > { %v1391_v27 = vpop.permute.xlu1 %1390 }
 0x388   : > { %v1371_v24 = vmul.f32 0.00390625, %v1370_v23 }
 0x38a   : > { %v1375_v26 = vrot.slane %v1371_v24, %v2166_v15 }
 0x38c   : > { %v1397_v29 = vsel %vm1396_vm8, %v1375_v26, %v1391_v27 }
 0x38d   : > { %v1400_v31 = vsel %vm1399_vm9, %v1397_v29, 0.0 }
 0x38e   : > { %1403 = vst.msk [vmem:[%s131_s28] sm:$0xf] %vm1402_vm10, %v1400_v31  ;;  %1404 = vst.msk [vmem:[%s131_s28 + $0x4] sm:$0xf] %vm1402_vm10, %v1400_v31 }
 0x3f2   : > { %v1393_v32 = vpop.permute.xlu0 %1392 }
 0x3f3   : > { %v1398_v33 = vsel %vm1396_vm8, %v1375_v26, %v1393_v32 }
 0x3f4   : > { %v1401_v15 = vsel %vm1399_vm9, %v1398_v33, 0.0 }
 0x3f5   : > { %1405 = vst.msk [vmem:[%s131_s28 + $0x8] sm:$0xf] %vm1402_vm10, %v1401_v15  ;;  %1406 = vst.msk [vmem:[%s131_s28 + $0xc] sm:$0xf] %vm1402_vm10, %v1401_v15 }
 0x3f6   : > { %1973 = shalt.err (!%p1970_p4)
}
 0x3f7   : > { %s1974_s16 = scalar_lea.hbm %s2578_s4, 256  ;;  %s1978_s23 = scalar_lea.hbm %s2625_s1, 512 }
 0x3f8   : > { %p1975_p5 = scmp.ne.s32.totalorder %s2578_s4, %s1974_s16  ;;  %p1979_p0 = scmp.lt.u32.totalorder %s2578_s4, %s2625_s1 }
 0x3f9   : > { %p1980_p1 = scmp.lt.u32.totalorder %s1978_s23, %s1974_s16  ;;  %p1982_p6 = scmp.lt.u32.totalorder %s1974_s16, %s2578_s4 }
 0x3fa   : > { %p1976_p8 = pnand %p1975_p5, %p2640_p11 }
 0x3fb   : > { %p1981_p3 = por %p1980_p1, %p1979_p0 }
 0x3fc   : > { %p1977_p9 = pneg %p1976_p8 }
 0x3fd   : > { %p1983_p12 = por %p1982_p6, %p1981_p3 }
 0x3ff   : > { %p1984_p13 = pnand %p1983_p12, %p1977_p9 }
 0x401   : > { %1987 = shalt.err (!%p1984_p13)
}
 0x402   : > { %s2035_s25 = smov 4  }
 0x403   : > { %1880 = dma.vmem_to_hbm [thread:$0]  (%p2640_p11), %s2573_s29, 256, %s2578_s4, %s1408_s5, %s2033_s26, %s2033_s26, %s2035_s25  }
 0x404 PF: > { %s1436_s27 = sand.u32 1, %s2014_s6   ;;  %p2641_p7 = scmp.ne.s32.totalorder %s2630_s19, 0 }
 0x405   : > { %p2642_p10 = scmp.ge.s32.totalorder %s2026_s9, 2  ;;  %s1437_s28 = scalar_lea.sflag [#allocation4], %s1436_s27 }
 0x407   : > { %p1887_p2 = pnand %p2642_p10, %p2641_p7 }
 0x409   : > { %2009 = dma.done.wait (!%p1887_p2), %s1437_s28, 256  }
 0x40a   : > { %2011 = vsyncadd (!%p1887_p2), %s1437_s28, 4294967040  ;;  %p14_p4 = scmp.ge.s32.totalorder %s2071_s12, 4   ;;  %s2643_s6 = smov %s2018_s7 }
 0x40b   : > { %s2644_s7 = smov %s2022_s8  ;;  %s2645_s8 = smov %s2083_s15 }
 0x40c   : > { %s2646_s9 = smov %s2071_s12  ;;  %16 = sbr.rel (!%p14_p4) target bundleno = 5 (0x5), region = 69 }
 0x413   :  { %1442 = vsyncpa [#allocation3], 1 }
 0x414   :  { %1444 = vsyncpa [#allocation3 + $0x1], 1 }
 0x415   :  { %1445 = vsyncpa [#allocation4], 1 }
 0x416   :  { %1447 = vsyncpa [#allocation4 + $0x1], 1 }

</bundles_post_ra>
